<compile_context>
chip_gen: v7x
topology: tpu7x:2x2x1
jax: 0.10.0
libtpu: 0.0.40
codegen_flags: <defaults>
</compile_context>

<pallas_src>
import jax
import jax.numpy as jnp
from jax.experimental import pallas as pl
from jax.experimental.pallas import tpu as pltpu


def _make_kernel(K: int):
    pad = K // 2

    def _im2col(h3):
        """h3: [TB, S, C] -> [TB*S, K*C] with zero 'same' padding along S."""
        TB, S, C = h3.shape
        taps = []
        for k in range(K):                       # static unroll (K = 3)
            off = k - pad
            if off < 0:
                z = jnp.zeros((TB, -off, C), h3.dtype)
                t = jnp.concatenate([z, h3[:, :S + off, :]], axis=1)
            elif off > 0:
                z = jnp.zeros((TB, off, C), h3.dtype)
                t = jnp.concatenate([h3[:, off:, :], z], axis=1)
            else:
                t = h3
            taps.append(t)
        return jnp.concatenate(taps, axis=-1).reshape(TB * S, K * C)

    def kernel(x_ref, w1_ref, b1_ref, w2_ref, b2_ref, w3_ref, b3_ref, out_ref):
        TB, S, F = x_ref.shape
        H = w1_ref.shape[1]

        x = x_ref[...]                                         # [TB, S, F] bf16

        # ---- Conv1d #1: one fused im2col MXU matmul + bias + ReLU ----
        a1 = jnp.dot(_im2col(x), w1_ref[...],
                     preferred_element_type=jnp.float32)       # [TB*S, H] f32
        h1 = jnp.maximum(a1 + b1_ref[...], 0.0)

        # ---- Conv1d #2: taps built in registers (no scratch round trip) ----
        h1_3 = h1.astype(jnp.bfloat16).reshape(TB, S, H)
        a2 = jnp.dot(_im2col(h1_3), w2_ref[...],
                     preferred_element_type=jnp.float32)       # [TB*S, H] f32
        h2 = jnp.maximum(a2 + b2_ref[...], 0.0)

        # ---- global mean pool over S, then Linear(H -> O) ----
        pooled = jnp.mean(h2.reshape(TB, S, H), axis=1)        # [TB, H] f32
        y = jnp.dot(pooled.astype(jnp.bfloat16), w3_ref[...],
                    preferred_element_type=jnp.float32) + b3_ref[...]

        out_ref[...] = y.astype(out_ref.dtype)                 # lane-dense [TB, O]

    return kernel


def cnn_backbone_forward(x, params, *, K=3, tb_max=32):
    """x: [B, S, F] float32 -> [B, O] float32."""
    w1, b1, w2, b2, w3, b3 = params
    B, S, F = x.shape
    H = w1.shape[2]
    O = w3.shape[1]

    # Batch tile: single grid step for small B; otherwise 8-aligned tiles that
    # stay well under the (smaller, 64 MiB) v7x VMEM budget with double
    # buffering of the activation block.
    TB = B if B <= tb_max else tb_max
    n_tiles = (B + TB - 1) // TB
    B_pad = n_tiles * TB
    if B_pad != B:
        x = jnp.pad(x, ((0, B_pad - B), (0, 0), (0, 0)))

    # bf16 MXU inputs (cast once in the wrapper); im2col weight layout [K*C, H].
    x_bf = x.astype(jnp.bfloat16)
    w1f = w1.reshape(K * F, H).astype(jnp.bfloat16)
    w2f = w2.reshape(K * H, H).astype(jnp.bfloat16)
    w3b = w3.astype(jnp.bfloat16)

    grid_spec = pltpu.PrefetchScalarGridSpec(
        num_scalar_prefetch=0,
        grid=(n_tiles,),
        in_specs=[
            pl.BlockSpec((TB, S, F), lambda b: (b, 0, 0)),     # x   (per-tile)
            pl.BlockSpec((K * F, H), lambda b: (0, 0)),        # w1  (resident)
            pl.BlockSpec((1, H),     lambda b: (0, 0)),        # b1
            pl.BlockSpec((K * H, H), lambda b: (0, 0)),        # w2
            pl.BlockSpec((1, H),     lambda b: (0, 0)),        # b2
            pl.BlockSpec((H, O),     lambda b: (0, 0)),        # w3
            pl.BlockSpec((1, O),     lambda b: (0, 0)),        # b3
        ],
        out_specs=pl.BlockSpec((TB, O), lambda b: (b, 0)),     # per-step block
    )

    out = pl.pallas_call(
        _make_kernel(K),
        out_shape=jax.ShapeDtypeStruct((B_pad, O), jnp.float32),
        grid_spec=grid_spec,
        compiler_params=pltpu.CompilerParams(
            dimension_semantics=("parallel",)),
    )(x_bf, w1f, b1, w2f, b2, w3b, b3)

    return out[:B] if B_pad != B else out


def _reference_forward(x, params, K=3):
    """Pure-JAX f32 reference with identical semantics (sanity check)."""
    w1, b1, w2, b2, w3, b3 = params
    B, S, F = x.shape

    def conv1d_same(h, w, b):                         # h: [B, S, C_in]
        hp = jnp.pad(h, ((0, 0), (K // 2, K // 2), (0, 0)))
        acc = jnp.zeros((B, S, w.shape[2]), jnp.float32)
        for k in range(K):
            acc = acc + jnp.einsum('bsf,fo->bso', hp[:, k:k + S, :], w[k])
        return jnp.maximum(acc + b[None, :, :], 0.0)

    h = conv1d_same(x, w1, b1)
    h = conv1d_same(h, w2, b2)
    pooled = jnp.mean(h, axis=1)                      # [B, H]
    return pooled @ w3 + b3


if __name__ == "__main__":
    B, S, F, H, O, K = 2, 8, 32, 32, 16, 3

    key = jax.random.PRNGKey(0)
    kx, k1, k2, k3, k4, k5, k6 = jax.random.split(key, 7)

    x = jax.random.normal(kx, (B, S, F), dtype=jnp.float32)

    # Deterministic synthetic parameters (shapes implied by the architecture).
    w1 = jax.random.normal(k1, (K, F, H), dtype=jnp.float32) * 0.1
    b1 = jax.random.normal(k2, (1, H), dtype=jnp.float32) * 0.1
    w2 = jax.random.normal(k3, (K, H, H), dtype=jnp.float32) * 0.1
    b2 = jax.random.normal(k4, (1, H), dtype=jnp.float32) * 0.1
    w3 = jax.random.normal(k5, (H, O), dtype=jnp.float32) * 0.1
    b3 = jax.random.normal(k6, (1, O), dtype=jnp.float32) * 0.1
    params = (w1, b1, w2, b2, w3, b3)

    out = cnn_backbone_forward(x, params, K=K)
    out = jax.block_until_ready(out)

    ref = _reference_forward(x, params, K=K)
    assert out.shape == (B, O), out.shape
    # bf16 MXU inputs with f32 accumulation -> loosen tolerance vs f32 reference.
    assert jnp.allclose(out, ref, atol=2e-2, rtol=2e-2), "mismatch vs reference"

    print("KERNEL_OK")
</pallas_src>

<mosaic_0001>
module attributes {stable_mosaic.version = 11 : i64} {
  func.func @kernel(%arg0: i32, %arg1: memref<2x8x32xbf16, #tpu.memory_space<vmem>>, %arg2: memref<96x32xbf16, #tpu.memory_space<vmem>>, %arg3: memref<1x32xf32, #tpu.memory_space<vmem>>, %arg4: memref<96x32xbf16, #tpu.memory_space<vmem>>, %arg5: memref<1x32xf32, #tpu.memory_space<vmem>>, %arg6: memref<32x16xbf16, #tpu.memory_space<vmem>>, %arg7: memref<1x16xf32, #tpu.memory_space<vmem>>, %arg8: memref<2x16xf32, #tpu.memory_space<vmem>>) attributes {dimension_semantics = [#tpu.dimension_semantics<parallel>], iteration_bounds = array<i64: 1>, scalar_prefetch = 0 : i64, scratch_operands = 0 : i64, tpu.core_type = #tpu.core_type<tc>, window_params = [{transform_indices = @transform_0, window_bounds = array<i64: 2, 8, 32>}, {pipeline_mode = #tpu.pipeline_mode<synchronous>, transform_indices = @transform_1, window_bounds = array<i64: 96, 32>}, {pipeline_mode = #tpu.pipeline_mode<synchronous>, transform_indices = @transform_2, window_bounds = array<i64: 1, 32>}, {pipeline_mode = #tpu.pipeline_mode<synchronous>, transform_indices = @transform_3, window_bounds = array<i64: 96, 32>}, {pipeline_mode = #tpu.pipeline_mode<synchronous>, transform_indices = @transform_4, window_bounds = array<i64: 1, 32>}, {pipeline_mode = #tpu.pipeline_mode<synchronous>, transform_indices = @transform_5, window_bounds = array<i64: 32, 16>}, {pipeline_mode = #tpu.pipeline_mode<synchronous>, transform_indices = @transform_6, window_bounds = array<i64: 1, 16>}, {transform_indices = @transform_7, window_bounds = array<i64: 2, 16>}]} {
    %c0 = arith.constant 0 : index
    %c0_0 = arith.constant 0 : index
    %c0_1 = arith.constant 0 : index
    %0 = vector.load %arg1[%c0, %c0_0, %c0_1] : memref<2x8x32xbf16, #tpu.memory_space<vmem>>, vector<2x8x32xbf16>
    %cst = arith.constant 0.000000e+00 : bf16
    %1 = vector.broadcast %cst : bf16 to vector<2x1x32xbf16>
    %2 = vector.extract_strided_slice %0 {offsets = [0, 0, 0], sizes = [2, 7, 32], strides = [1, 1, 1]} : vector<2x8x32xbf16> to vector<2x7x32xbf16>
    %3 = tpu.concatenate %1, %2 in 1 : vector<2x1x32xbf16>, vector<2x7x32xbf16> -> vector<2x8x32xbf16>
    %cst_2 = arith.constant 0.000000e+00 : bf16
    %4 = vector.broadcast %cst_2 : bf16 to vector<2x1x32xbf16>
    %5 = vector.extract_strided_slice %0 {offsets = [0, 1, 0], sizes = [2, 7, 32], strides = [1, 1, 1]} : vector<2x8x32xbf16> to vector<2x7x32xbf16>
    %6 = tpu.concatenate %5, %4 in 1 : vector<2x7x32xbf16>, vector<2x1x32xbf16> -> vector<2x8x32xbf16>
    %7 = tpu.concatenate %3, %0, %6 in 2 : vector<2x8x32xbf16>, vector<2x8x32xbf16>, vector<2x8x32xbf16> -> vector<2x8x96xbf16>
    %8 = vector.shape_cast %7 : vector<2x8x96xbf16> to vector<16x96xbf16>
    %c0_3 = arith.constant 0 : index
    %c0_4 = arith.constant 0 : index
    %9 = vector.load %arg2[%c0_3, %c0_4] : memref<96x32xbf16, #tpu.memory_space<vmem>>, vector<96x32xbf16>
    %cst_5 = arith.constant dense<0.000000e+00> : vector<16x32xf32>
    %10 = tpu.matmul %8, %9, %cst_5 {dimension_numbers = #tpu.dot_dimension_numbers<[1], [0], [0], [1], [0, 0, 1, 1], [], []>} : vector<16x96xbf16>, vector<96x32xbf16>, vector<16x32xf32> -> vector<16x32xf32>
    %c0_6 = arith.constant 0 : index
    %c0_7 = arith.constant 0 : index
    %11 = vector.load %arg3[%c0_6, %c0_7] : memref<1x32xf32, #tpu.memory_space<vmem>>, vector<1x32xf32>
    %12 = vector.broadcast %11 : vector<1x32xf32> to vector<16x32xf32>
    %13 = arith.addf %10, %12 : vector<16x32xf32>
    %cst_8 = arith.constant 0.000000e+00 : f32
    %14 = vector.broadcast %cst_8 : f32 to vector<16x32xf32>
    %15 = arith.maximumf %13, %14 : vector<16x32xf32>
    %16 = arith.truncf %15 : vector<16x32xf32> to vector<16x32xbf16>
    %17 = vector.shape_cast %16 : vector<16x32xbf16> to vector<2x8x32xbf16>
    %cst_9 = arith.constant 0.000000e+00 : bf16
    %18 = vector.broadcast %cst_9 : bf16 to vector<2x1x32xbf16>
    %19 = vector.extract_strided_slice %17 {offsets = [0, 0, 0], sizes = [2, 7, 32], strides = [1, 1, 1]} : vector<2x8x32xbf16> to vector<2x7x32xbf16>
    %20 = tpu.concatenate %18, %19 in 1 : vector<2x1x32xbf16>, vector<2x7x32xbf16> -> vector<2x8x32xbf16>
    %cst_10 = arith.constant 0.000000e+00 : bf16
    %21 = vector.broadcast %cst_10 : bf16 to vector<2x1x32xbf16>
    %22 = vector.extract_strided_slice %17 {offsets = [0, 1, 0], sizes = [2, 7, 32], strides = [1, 1, 1]} : vector<2x8x32xbf16> to vector<2x7x32xbf16>
    %23 = tpu.concatenate %22, %21 in 1 : vector<2x7x32xbf16>, vector<2x1x32xbf16> -> vector<2x8x32xbf16>
    %24 = tpu.concatenate %20, %17, %23 in 2 : vector<2x8x32xbf16>, vector<2x8x32xbf16>, vector<2x8x32xbf16> -> vector<2x8x96xbf16>
    %25 = vector.shape_cast %24 : vector<2x8x96xbf16> to vector<16x96xbf16>
    %c0_11 = arith.constant 0 : index
    %c0_12 = arith.constant 0 : index
    %26 = vector.load %arg4[%c0_11, %c0_12] : memref<96x32xbf16, #tpu.memory_space<vmem>>, vector<96x32xbf16>
    %cst_13 = arith.constant dense<0.000000e+00> : vector<16x32xf32>
    %27 = tpu.matmul %25, %26, %cst_13 {dimension_numbers = #tpu.dot_dimension_numbers<[1], [0], [0], [1], [0, 0, 1, 1], [], []>} : vector<16x96xbf16>, vector<96x32xbf16>, vector<16x32xf32> -> vector<16x32xf32>
    %c0_14 = arith.constant 0 : index
    %c0_15 = arith.constant 0 : index
    %28 = vector.load %arg5[%c0_14, %c0_15] : memref<1x32xf32, #tpu.memory_space<vmem>>, vector<1x32xf32>
    %29 = vector.broadcast %28 : vector<1x32xf32> to vector<16x32xf32>
    %30 = arith.addf %27, %29 : vector<16x32xf32>
    %cst_16 = arith.constant 0.000000e+00 : f32
    %31 = vector.broadcast %cst_16 : f32 to vector<16x32xf32>
    %32 = arith.maximumf %30, %31 : vector<16x32xf32>
    %33 = vector.shape_cast %32 : vector<16x32xf32> to vector<2x8x32xf32>
    %cst_17 = arith.constant dense<0.000000e+00> : vector<2x32xf32>
    %34 = vector.multi_reduction <add>, %33, %cst_17 [1] : vector<2x8x32xf32> to vector<2x32xf32>
    %cst_18 = arith.constant 8.000000e+00 : f32
    %35 = vector.broadcast %cst_18 : f32 to vector<2x32xf32>
    %36 = arith.divf %34, %35 : vector<2x32xf32>
    %37 = arith.truncf %36 : vector<2x32xf32> to vector<2x32xbf16>
    %c0_19 = arith.constant 0 : index
    %c0_20 = arith.constant 0 : index
    %38 = vector.load %arg6[%c0_19, %c0_20] : memref<32x16xbf16, #tpu.memory_space<vmem>>, vector<32x16xbf16>
    %cst_21 = arith.constant dense<0.000000e+00> : vector<2x16xf32>
    %39 = tpu.matmul %37, %38, %cst_21 {dimension_numbers = #tpu.dot_dimension_numbers<[1], [0], [0], [1], [0, 0, 1, 1], [], []>} : vector<2x32xbf16>, vector<32x16xbf16>, vector<2x16xf32> -> vector<2x16xf32>
    %c0_22 = arith.constant 0 : index
    %c0_23 = arith.constant 0 : index
    %40 = vector.load %arg7[%c0_22, %c0_23] : memref<1x16xf32, #tpu.memory_space<vmem>>, vector<1x16xf32>
    %41 = vector.broadcast %40 : vector<1x16xf32> to vector<2x16xf32>
    %42 = arith.addf %39, %41 : vector<2x16xf32>
    %c0_24 = arith.constant 0 : index
    %c0_25 = arith.constant 0 : index
    %43 = vector.load %arg8[%c0_24, %c0_25] : memref<2x16xf32, #tpu.memory_space<vmem>>, vector<2x16xf32>
    tpu.vector_store %arg8[%c0_24, %c0_25], %42 {strides = array<i32>} : memref<2x16xf32, #tpu.memory_space<vmem>>, vector<2x16xf32>,
    return
  }
  func.func @transform_0(%arg0: i32) -> (i32, i32, i32) {
    %c0_i32 = arith.constant 0 : i32
    %c0_i32_0 = arith.constant 0 : i32
    %c0_i32_1 = arith.constant 0 : i32
    return %arg0, %c0_i32, %c0_i32_0 : i32, i32, i32
  }
  func.func @transform_1(%arg0: i32) -> (i32, i32) {
    %c0_i32 = arith.constant 0 : i32
    %c0_i32_0 = arith.constant 0 : i32
    %c0_i32_1 = arith.constant 0 : i32
    return %c0_i32, %c0_i32_0 : i32, i32
  }
  func.func @transform_2(%arg0: i32) -> (i32, i32) {
    %c0_i32 = arith.constant 0 : i32
    %c0_i32_0 = arith.constant 0 : i32
    %c0_i32_1 = arith.constant 0 : i32
    return %c0_i32, %c0_i32_0 : i32, i32
  }
  func.func @transform_3(%arg0: i32) -> (i32, i32) {
    %c0_i32 = arith.constant 0 : i32
    %c0_i32_0 = arith.constant 0 : i32
    %c0_i32_1 = arith.constant 0 : i32
    return %c0_i32, %c0_i32_0 : i32, i32
  }
  func.func @transform_4(%arg0: i32) -> (i32, i32) {
    %c0_i32 = arith.constant 0 : i32
    %c0_i32_0 = arith.constant 0 : i32
    %c0_i32_1 = arith.constant 0 : i32
    return %c0_i32, %c0_i32_0 : i32, i32
  }
  func.func @transform_5(%arg0: i32) -> (i32, i32) {
    %c0_i32 = arith.constant 0 : i32
    %c0_i32_0 = arith.constant 0 : i32
    %c0_i32_1 = arith.constant 0 : i32
    return %c0_i32, %c0_i32_0 : i32, i32
  }
  func.func @transform_6(%arg0: i32) -> (i32, i32) {
    %c0_i32 = arith.constant 0 : i32
    %c0_i32_0 = arith.constant 0 : i32
    %c0_i32_1 = arith.constant 0 : i32
    return %c0_i32, %c0_i32_0 : i32, i32
  }
  func.func @transform_7(%arg0: i32) -> (i32, i32) {
    %c0_i32 = arith.constant 0 : i32
    %c0_i32_0 = arith.constant 0 : i32
    return %arg0, %c0_i32 : i32, i32
  }
}

</mosaic_0001>

<bundles_post_ra>
// kernel: tpu_custom_call.1
= control target key start
LH: loop header
LB: loop body
LE: loop exit
PB: predicated region body
PF: predicated region fallthrough
CT: control target
= control target key end

     0   :  { %vm63_vm0 = vcmask 1043456   ;;  %vm64_vm1 = vsmask.f32 3328  ;;  %s593_s26 = smov 32   ;;  %v594_v4 = vmov 0.0   ;;  %s595_s9 = smov 64   ;;  %s772_s0 = inlined_call_operand.vmem [shape: bf16[2,8,32], index: 0, kind: input, shape index: {}]   ;;  %s773_s1 = inlined_call_operand.vmem [shape: bf16[96,32], index: 1, kind: input, shape index: {}]   ;;  %s774_s2 = inlined_call_operand.vmem [shape: f32[1,32], index: 2, kind: input, shape index: {}]   ;;  %s775_s3 = inlined_call_operand.vmem [shape: bf16[96,32], index: 3, kind: input, shape index: {}]   ;;  %s776_s4 = inlined_call_operand.vmem [shape: f32[1,32], index: 4, kind: input, shape index: {}]   ;;  %s777_s5 = inlined_call_operand.vmem [shape: bf16[32,16], index: 5, kind: input, shape index: {}]   ;;  %s778_s6 = inlined_call_operand.vmem [shape: f32[1,16], index: 6, kind: input, shape index: {}]   ;;  %s779_s7 = inlined_call_operand.hbm [shape: f32[2,16], index: 7, kind: output, shape index: {}]  }
   0x1   :  { %v553_v0 = vld [vmem:[%s772_s0] ss:$0 sps:$4 sm:$0xff]   ;;  %v554_v3 = vld [vmem:[%s772_s0 + $0x4] ss:$0 sps:$4 sm:$0xff]   ;;  %508 = vmatprep.subr.bf16.mxu0 %v594_v4  ;;  %524 = vmatprep.subr.bf16.mxu1 %v594_v4  ;;  %vm650_vm2 = vmand %vm63_vm0, %vm64_vm1  ;;  %vm596_vm3 = vmmov 0  }
   0x2   :  { %68 = vrot.lane.b32.xlu0 %v553_v0, %s593_s26  ;;  %v37_v1 = vshrl.u32 %v553_v0, 16  ;;  %v40_v2 = vshll.u32 %v553_v0, 16  ;;  %v555_v5 = vld [vmem:[%s773_s1] sm:$0xff]   ;;  %v44_v9 = vshrl.u32 %v554_v3, 16  ;;  %v47_v10 = vshll.u32 %v554_v3, 16  ;;  %v556_v11 = vld [vmem:[%s773_s1 + $0x8] sm:$0xff]   ;;  %520 = vmatprep.mubr.msk.bf16.mxu0 %vm596_vm3, %v594_v4 }
   0x3   :  { %509 = vmatpush3.bf16.msra.mxu0 %v555_v5  ;;  %v557_v19 = vld [vmem:[%s773_s1 + $0x10] sm:$0xff]   ;;  %v558_v21 = vld [vmem:[%s773_s1 + $0x18] sm:$0xff]   ;;  %536 = vmatprep.mubr.msk.bf16.mxu1 %vm596_vm3, %v594_v4 }
   0x4   :  { %v57_v6 = vrot.slane %v40_v2, 1  ;;  %v39_v8 = vrot.slane %v37_v1, 7  ;;  %v46_v13 = vrot.slane %v44_v9, 7  ;;  %v59_v14 = vrot.slane %v47_v10, 1  ;;  %510 = vmatprep.subr.bf16.mxu0 %v594_v4 }
   0x6   :  { %v58_v12 = vor.u32 %v57_v6, %v37_v1  ;;  %70 = vrot.lane.b32.xlu0 %v554_v3, %s593_s26  ;;  %v42_v15 = vor.u32 %v40_v2, %v39_v8  ;;  %v60_v17 = vor.u32 %v59_v14, %v44_v9  ;;  %v49_v18 = vor.u32 %v47_v10, %v46_v13 }
   0x7   :  { %511 = vmatpush3.bf16.msra.mxu0 %v556_v11 }
   0x8   :  { %v66_v16 = vsel %vm650_vm2, %v58_v12, 0  ;;  %v67_v20 = vsel %vm650_vm2, %v60_v17, 0  ;;  %512 = vmatprep.subr.bf16.mxu0 %v594_v4 }
   0x9   :  { %74 = vrot.lane.b32.xlu1 %v66_v16, %s595_s9 }
   0xb   :  { %513 = vmatpush3.bf16.msra.mxu0 %v557_v19 }
   0xc   :  { %514 = vmatprep.subr.bf16.mxu0 %v594_v4 }
   0xd   :  { %76 = vrot.lane.b32.xlu1 %v67_v20, %s595_s9 }
   0xe   :  { %12 = vsyncpa [#allocation3], 0  ;;  %v559_v22 = vld [vmem:[%s773_s1 + $0x20] sm:$0xff]   ;;  %v560_v23 = vld [vmem:[%s773_s1 + $0x28] sm:$0xff]   ;;  %vm52_vm4 = vcmask 1040384   ;;  %vm78_vm7 = vcmask 261120  }
   0xf   :  { %515 = vmatpush3.bf16.msra.mxu0 %v558_v21  ;;  %vm53_vm5 = vsmask.f32 256  ;;  %vm85_vm8 = vcmask 523264   ;;  %vm150_vm9 = vcmask 785408   ;;  %v561_v36 = vld [vmem:[%s775_s3] sm:$0xff]   ;;  %v562_v37 = vld [vmem:[%s775_s3 + $0x8] sm:$0xff]  }
  0x10   :  { %516 = vmatprep.subr.bf16.mxu0 %v594_v4  ;;  %vm686_vm6 = vmand %vm52_vm4, %vm53_vm5  ;;  %525 = vmatpush3.bf16.msra.mxu1 %v561_v36  ;;  %v563_v38 = vld [vmem:[%s775_s3 + $0x10] sm:$0xff]   ;;  %v564_v39 = vld [vmem:[%s775_s3 + $0x18] sm:$0xff]   ;;  %vm389_vm10 = vcmask 1041409   ;;  %s597_s11 = smov [#allocation2]   ;;  %vm447_vm11 = vcmask 123904  }
  0x11   :  { %v55_v26 = vsel %vm686_vm6, 0, %v42_v15  ;;  %v56_v27 = vsel %vm686_vm6, 0, %v49_v18  ;;  %526 = vmatprep.subr.bf16.mxu1 %v594_v4  ;;  %v565_v40 = vld [vmem:[%s775_s3 + $0x20] sm:$0xff]   ;;  %v566_v45 = vld [vmem:[%s775_s3 + $0x28] sm:$0xff]   ;;  %s455_s12 = sshll.u32 %s597_s11, 4  ;;  %s456_s12 = int_to_ptr.vmem [resolvable:$true] %s455_s12 }
  0x12   :  { %v465_v41 = vld [vmem:[%s774_s2] ss:$0 sm:$0xff]  ;;  %v568_v16 = vld [vmem:[%s777_s5 + $0x8] sm:$0xff]   ;;  %s569_s13 = scalar_lea.vmem %s456_s12, 32  ;;  %p574_p1 = scmp.lt.s32.totalorder %s456_s12, %s456_s12 }
  0x13   :  { %517 = vmatpush3.bf16.msra.mxu0 %v559_v22  ;;  %v567_v15 = vld [vmem:[%s777_s5] sm:$0xff]   ;;  %p570_p0 = scmp.ne.s32.totalorder %s456_s12, %s569_s13  ;;  %p575_p2 = scmp.lt.s32.totalorder %s569_s13, %s569_s13 }
  0x14   :  { %518 = vmatprep.subr.bf16.mxu0 %v594_v4  ;;  %527 = vmatpush3.bf16.msra.mxu1 %v562_v37  ;;  %v476_v17 = vld [vmem:[%s776_s4] ss:$0 sm:$0xff] }
  0x15   :  { %528 = vmatprep.subr.bf16.mxu1 %v594_v4  ;;  %p576_p3 = por %p575_p2, %p574_p1 }
  0x17   :  { %519 = vmatpush3.bf16.msra.mxu0 %v560_v23  ;;  %p577_p4 = pnand %p576_p3, %p570_p0 }
  0x18   :  { %540 = vmatprep.subr.bf16.mxu0 %v594_v4  ;;  %529 = vmatpush3.bf16.msra.mxu1 %v563_v38 }
  0x19   :  { %530 = vmatprep.subr.bf16.mxu1 %v594_v4 }
  0x1c   :  { %531 = vmatpush3.bf16.msra.mxu1 %v564_v39 }
  0x1d   :  { %532 = vmatprep.subr.bf16.mxu1 %v594_v4 }
  0x20   :  { %533 = vmatpush3.bf16.msra.mxu1 %v565_v40 }
  0x21   :  { %534 = vmatprep.subr.bf16.mxu1 %v594_v4 }
  0x24   :  { %535 = vmatpush3.bf16.msra.mxu1 %v566_v45 }
  0x74   :  { %v69_v24 = vpop.permute.xlu0 %68 }
  0x75   :  { %v81_v30 = vsel %vm78_vm7, %v55_v26, %v69_v24 }
  0x78   :  { %v71_v28 = vpop.permute.xlu0 %70 }
  0x79   :  { %v84_v31 = vsel %vm78_vm7, %v56_v27, %v71_v28 }
  0x7b   :  { %v75_v29 = vpop.permute.xlu1 %74 }
  0x7c   :  { %v87_v33 = vsel %vm85_vm8, %v81_v30, %v75_v29 }
  0x7f   :  { %v77_v32 = vpop.permute.xlu1 %76 }
  0x80   :  { %v89_v34 = vsel %vm85_vm8, %v84_v31, %v77_v32 }
  0x81   :  { %v466_v35 = vcombine.low %v87_v33, %v89_v34 }
  0x83   :  { %521 = vmatmul.mubr.msk.bf16.vlgmr.msra.gmra.mrb[0].mxu0 %vm150_vm9, %v466_v35 }
  0x84   :  { %544 = vmatprep.mubr.msk.bf16.mxu0 %vm596_vm3, %v594_v4  ;;  %541 = vmatpush3.bf16.msra.mxu0 %v567_v15 }
  0x85   :  { %542 = vmatprep.subr.bf16.mxu0 %v594_v4 }
  0x88   :  { %543 = vmatpush3.bf16.msra.mxu0 %v568_v16 }
 0x156   :  { %v188_v42 = vpop.f32.mrb[0].mxu0 }
 0x157   :  { %v189_v43 = vadd.f32 %v465_v41, %v188_v42  ;;  %v522_v44 = vpop.f32.mrb[1].mxu0 }
 0x158   :  { %v191_v46 = vpop.f32.mrb[2].mxu0 }
 0x159   :  { %v195_v47 = vmax.f32 %v189_v43, 0.0  ;;  %v192_v48 = vadd.f32 %v465_v41, %v191_v46  ;;  %v523_v49 = vpop.f32.mrb[3].mxu0 }
 0x15b   :  { %v489_v50 = vpack.c.bf16 %v195_v47, %v195_v47  ;;  %v196_v51 = vmax.f32 %v192_v48, 0.0  ;;  %v485_v47 = vld [vmem:[%s778_s6] ss:$0 sm:$0xff] }
 0x15d   :  { %v207_v52 = vshll.u32 %v489_v50, 16  ;;  %v490_v53 = vpack.c.bf16 %v196_v51, %v196_v51  ;;  %229 = vrot.lane.b32.xlu0 %v489_v50, %s593_s26  ;;  %v204_v54 = vshrl.u32 %v489_v50, 16 }
 0x15f   :  { %v214_v55 = vshll.u32 %v490_v53, 16  ;;  %231 = vrot.lane.b32.xlu1 %v490_v53, %s593_s26  ;;  %v221_v56 = vrot.slane %v207_v52, 1  ;;  %v206_v57 = vrot.slane %v204_v54, 7  ;;  %v211_v58 = vshrl.u32 %v490_v53, 16 }
 0x161   :  { %v222_v59 = vor.u32 %v221_v56, %v204_v54  ;;  %v223_v60 = vrot.slane %v214_v55, 1  ;;  %v213_v61 = vrot.slane %v211_v58, 7  ;;  %v209_v62 = vor.u32 %v207_v52, %v206_v57 }
 0x163   :  { %v227_v63 = vsel %vm650_vm2, %v222_v59, 0  ;;  %v224_v0 = vor.u32 %v223_v60, %v211_v58  ;;  %v216_v1 = vor.u32 %v214_v55, %v213_v61  ;;  %v219_v8 = vsel %vm686_vm6, 0, %v209_v62 }
 0x164   :  { %235 = vrot.lane.b32.xlu0 %v227_v63, %s595_s9 }
 0x165   :  { %v228_v2 = vsel %vm650_vm2, %v224_v0, 0  ;;  %v220_v9 = vsel %vm686_vm6, 0, %v216_v1 }
 0x166   :  { %237 = vrot.lane.b32.xlu1 %v228_v2, %s595_s9 }
 0x1cf   :  { %v230_v3 = vpop.permute.xlu0 %229 }
 0x1d0   :  { %v241_v10 = vsel %vm78_vm7, %v219_v8, %v230_v3 }
 0x1d1   :  { %v232_v5 = vpop.permute.xlu1 %231 }
 0x1d2   :  { %v244_v11 = vsel %vm78_vm7, %v220_v9, %v232_v5 }
 0x1d6   :  { %v236_v6 = vpop.permute.xlu0 %235 }
 0x1d7   :  { %v246_v13 = vsel %vm85_vm8, %v241_v10, %v236_v6 }
 0x1d8   :  { %v238_v12 = vpop.permute.xlu1 %237 }
 0x1d9   :  { %v248_v7 = vsel %vm85_vm8, %v244_v11, %v238_v12 }
 0x1da   :  { %v477_v14 = vcombine.low %v246_v13, %v248_v7 }
 0x1dc   :  { %537 = vmatmul.mubr.msk.bf16.vlgmr.msra.gmra.mrb[0].mxu1 %vm150_vm9, %v477_v14 }
 0x2af   :  { %v346_v18 = vpop.f32.mrb[0].mxu1 }
 0x2b0   :  { %v347_v19 = vadd.f32 %v476_v17, %v346_v18  ;;  %v538_v20 = vpop.f32.mrb[1].mxu1 }
 0x2b1   :  { %v349_v21 = vpop.f32.mrb[2].mxu1 }
 0x2b2   :  { %v353_v22 = vmax.f32 %v347_v19, 0.0  ;;  %v350_v23 = vadd.f32 %v476_v17, %v349_v21  ;;  %v539_v24 = vpop.f32.mrb[3].mxu1 }
 0x2b4   :  { %v355_v25 = vsel %vm78_vm7, %v353_v22, 0.0  ;;  %v354_v26 = vmax.f32 %v350_v23, 0.0 }
 0x2b5   :  { %v356_v4 = vrot.slane %v355_v25, 4 }
 0x2b6   :  { %v362_v27 = vsel %vm78_vm7, %v354_v26, 0.0 }
 0x2b7   :  { %v357_v28 = vadd.f32 %v356_v4, %v355_v25  ;;  %v363_v29 = vrot.slane %v362_v27, 4 }
 0x2b9   :  { %v358_v30 = vrot.slane %v357_v28, 2  ;;  %v364_v31 = vadd.f32 %v363_v29, %v362_v27 }
 0x2bb   :  { %v359_v32 = vadd.f32 %v358_v30, %v357_v28  ;;  %v365_v33 = vrot.slane %v364_v31, 2 }
 0x2bd   :  { %v360_v34 = vrot.slane %v359_v32, 1  ;;  %v366_v35 = vadd.f32 %v365_v33, %v364_v31 }
 0x2bf   :  { %v361_v36 = vadd.f32 %v360_v34, %v359_v32  ;;  %v367_v37 = vrot.slane %v366_v35, 1 }
 0x2c1   :  { %v370_v38 = vmul.f32 0.125, %v361_v36  ;;  %v368_v39 = vadd.f32 %v367_v37, %v366_v35 }
 0x2c3   :  { %v372_v40 = vpack.c.bf16 %v370_v38, %v370_v38  ;;  %v371_v41 = vmul.f32 0.125, %v368_v39 }
 0x2c5   :  { %v373_v42 = vpack.c.bf16 %v371_v41, %v371_v41  ;;  %v387_v43 = vunpack.c.l.b16 %v372_v40 }
 0x2c7   :  { %v388_v44 = vunpack.c.l.b16 %v373_v42 }
 0x2c9   :  { %v390_v45 = vsel %vm389_vm10, %v388_v44, %v387_v43 }
 0x2ca   :  { %v391_v46 = vpack.c.b16 %v390_v45, %v390_v45 }
 0x2cc   :  { %545 = vmatmul.mubr.msk.bf16.vlgmr.msra.gmra.mrb[4].mxu0 %vm78_vm7, %v391_v46 }
 0x39f   :  { %v441_v48 = vpop.f32.mrb[4].mxu0 }
 0x3a0   :  { %v442_v49 = vadd.f32 %v485_v47, %v441_v48  ;;  %v546_v50 = vpop.f32.mrb[5].mxu0 }
 0x3a1   :  { %v444_v51 = vpop.f32.mrb[6].mxu0 }
 0x3a2   :  { %v547_v52 = vpop.f32.mrb[7].mxu0  ;;  %448 = vst.msk [vmem:[#allocation2] sm:$0x3] %vm447_vm11, %v442_v49 }
 0x3a3   :  { %580 = shalt.err (!%p577_p4)
}
 0x3a4   :  { %s581_s6 = scalar_lea.hbm %s779_s7, 32 }
 0x3a5   :  { %p582_p5 = scmp.ne.s32.totalorder %s779_s7, %s581_s6  ;;  %p585_p6 = scmp.lt.u32.totalorder %s581_s6, %s779_s7 }
 0x3a7   :  { %p587_p7 = pnand %p585_p6, %p582_p5 }
 0x3a9   :  { %590 = shalt.err (!%p587_p7)
}
 0x3aa   :  { %458 = dma.vmem_to_hbm [thread:$0]  %s456_s12, 32, %s779_s7, [#allocation3]  }
 0x3ab   :  { %591 = dma.done.wait [#allocation3], 32  }
 0x3ac   :  { %592 = vsyncadd [#allocation3], 4294967264 }
 0x3ad   :  { %462 = vsyncpa [#allocation3], 1 }

</bundles_post_ra>
